<compile_context>
chip_gen: v6e
topology: v6e:2x2x1
jax: 0.10.0
libtpu: 0.0.40
codegen_flags: <defaults>
</compile_context>

<pallas_src>
import functools
import math

import jax
import jax.numpy as jnp
from jax.experimental import pallas as pl
from jax.experimental.pallas import tpu as pltpu

# ----------------------------- configuration ------------------------------- #
B, CIN, H, W = 2, 3, 32, 32          # input images (NCHW, like PyTorch)
FH, FW = 8, 8                        # feature map after 4x4 / stride-4 conv
P = FH * FW                          # 64 spatial locations per image
BP = B * P                           # 128 fused lanes (batch-major: lane = b*P + p)
KIN = 4 * 4 * CIN                    # 48 im2col patch size
CFEAT = 32                           # backbone feature channels
A = 4                                # anchors per location
NUM_CLASSES = 8                      # includes background (class 0)
N_ANCHORS = A * P                    # 256 anchors per image, ordered n = a*P + p
HEAD_ROWS = A * NUM_CLASSES + A * 4  # 48 = 32 cls rows + 16 box rows

SCORE_THRESH = 0.01                  # backend.score_thresh (torchvision default)
NMS_THRESH = 0.45                    # backend.nms_thresh
PER_CLASS_TOPK = 4                   # backend.topk_candidates (per class)
DETECTIONS_PER_IMG = 8               # backend.detections_per_img
TOPK_CANDIDATES = 2                  # SSDClassScoresExtractor.topk_candidates
BOX_WEIGHTS = (10.0, 10.0, 5.0, 5.0)
BBOX_XFORM_CLIP = math.log(1000.0 / 16.0)


# ------------------------------ fused Pallas kernel ------------------------- #
def _ssd_fused_kernel(x_ref, wbb_ref, bbb_ref, whd_ref, bhd_ref, clip_ref, out_ref,
                      *, img_h, img_w, num_classes, num_anchors, bp):
    """Single invocation, whole batch on lanes.
    Row layout of `head` / `out`:
      rows 0..A*C-1          : class logits / probs, row = a*C + c
      rows A*C   .. A*C+2A-1 : decoded centers  [pcx(a=0..A-1), pcy(a=0..A-1)]
      rows A*C+2A.. A*C+4A-1 : size logits      [dw(a), dh(a)]   (+log(anchor wh))
    Out replaces the size rows with x1|y1 (mins) and x2|y2 (maxs)."""
    A_ = num_anchors
    C = num_classes

    # backbone 4x4/stride-4 conv as one MXU matmul (bf16 in, f32 accum) + ReLU
    feats = jnp.dot(wbb_ref[...], x_ref[...], preferred_element_type=jnp.float32)
    feats = jnp.maximum(feats + bbb_ref[...], 0.0)                      # [CFEAT, BP]

    # combined cls+box head matmul; 1/box_weights, anchor sizes and anchor centers
    # are pre-folded into whd/bhd, so rows A*C..A*C+2A-1 already hold pcx/pcy.
    head = jnp.dot(whd_ref[...], feats.astype(jnp.bfloat16),
                   preferred_element_type=jnp.float32) + bhd_ref[...]   # [48, BP]

    # ONE softmax over classes for all anchors/images/positions (sublane reduce)
    logits = head[:A_ * C, :].reshape(A_, C, bp)                        # [A, C, BP]
    m = jnp.max(logits, axis=1, keepdims=True)
    e = jnp.exp(logits - m)
    s = jnp.sum(e, axis=1, keepdims=True)
    probs = (e / s).reshape(A_ * C, bp)                                 # exact softmax

    # slab-wise box decode + clip-to-image (all slices are (8,128)-tile aligned)
    pctr = head[A_ * C:A_ * C + 2 * A_, :]                              # [2A, BP]
    half = 0.5 * jnp.exp(jnp.minimum(head[A_ * C + 2 * A_:, :], clip_ref[...]))
    upper = jnp.concatenate([jnp.full((A_, bp), img_w, jnp.float32),
                             jnp.full((A_, bp), img_h, jnp.float32)], axis=0)
    mins = jnp.minimum(jnp.maximum(pctr - half, 0.0), upper)            # x1 | y1
    maxs = jnp.minimum(jnp.maximum(pctr + half, 0.0), upper)            # x2 | y2

    out_ref[...] = jnp.concatenate([probs, mins, maxs], axis=0)         # [48, BP]


def pallas_ssd_fused(x_fused, w_bb, b_bb_full, w_head, b_head_full, clipwh, img_hw):
    """x_fused: [KIN, B*P] bf16 im2col'd batch.  Returns one [HEAD_ROWS, B*P] slab."""
    bp = x_fused.shape[-1]
    kern = functools.partial(
        _ssd_fused_kernel,
        img_h=float(img_hw[0]), img_w=float(img_hw[1]),
        num_classes=NUM_CLASSES, num_anchors=A, bp=bp,
    )
    return pl.pallas_call(
        kern,
        out_shape=jax.ShapeDtypeStruct((HEAD_ROWS, bp), jnp.float32),
        grid_spec=pltpu.PrefetchScalarGridSpec(
            num_scalar_prefetch=0,
            grid=(1,),
            in_specs=[
                pl.BlockSpec((KIN, bp), lambda i: (0, 0)),
                pl.BlockSpec((CFEAT, KIN), lambda i: (0, 0)),
                pl.BlockSpec((CFEAT, bp), lambda i: (0, 0)),
                pl.BlockSpec((HEAD_ROWS, CFEAT), lambda i: (0, 0)),
                pl.BlockSpec((HEAD_ROWS, bp), lambda i: (0, 0)),
                pl.BlockSpec((2 * A, bp), lambda i: (0, 0)),
            ],
            out_specs=pl.BlockSpec((HEAD_ROWS, bp), lambda i: (0, 0)),
        ),
        compiler_params=pltpu.CompilerParams(
            dimension_semantics=("arbitrary",)),
    )(x_fused, w_bb, b_bb_full, w_head, b_head_full, clipwh)


# ----------------------------- params & folding ----------------------------- #
def init_params(key):
    k1, k2, k3 = jax.random.split(key, 3)
    # backbone conv-as-matmul weights ([out, kh*kw*cin]); NOTE: real torchvision
    # conv weights [out,in,kh,kw] would need permuting to (kh,kw,cin) flat order.
    w_bb = jax.random.normal(k1, (CFEAT, KIN), jnp.float32) * 0.1
    b_bb = jnp.zeros((CFEAT,), jnp.float32)
    # cls head, rows ordered (anchor a, class c)
    w_cls = jax.random.normal(k2, (A * NUM_CLASSES, CFEAT), jnp.float32) * 0.1
    b_cls = jnp.zeros((A * NUM_CLASSES,), jnp.float32)
    # box head, canonical torchvision ordering (anchor a, coord k=(dx,dy,dw,dh))
    w_box = jax.random.normal(k3, (A, 4, CFEAT), jnp.float32) * 0.1
    b_box = jnp.zeros((A, 4), jnp.float32)

    # anchors (default boxes): centers per spatial position, sizes per anchor
    stride_y, stride_x = H / FH, W / FW
    ys = (jnp.arange(FH, dtype=jnp.float32) + 0.5) * stride_y
    xs = (jnp.arange(FW, dtype=jnp.float32) + 0.5) * stride_x
    cy = jnp.broadcast_to(ys[:, None], (FH, FW)).reshape(-1)            # [P]
    cx = jnp.broadcast_to(xs[None, :], (FH, FW)).reshape(-1)            # [P]
    anchor_wh = jnp.array([[4.0, 4.0], [8.0, 8.0], [6.0, 3.0], [3.0, 6.0]],
                          jnp.float32)                                  # [A, 2]
    aw, ah = anchor_wh[:, 0], anchor_wh[:, 1]

    # fold 1/box_weights and anchor widths/heights into the box head
    wx, wy, ww, wh = BOX_WEIGHTS
    scale = jnp.stack([aw / wx, ah / wy,
                       jnp.full((A,), 1.0 / ww), jnp.full((A,), 1.0 / wh)], axis=1)
    w_box_f = w_box * scale[:, :, None]
    b_box_f = b_box * scale
    b_box_f = b_box_f.at[:, 2].add(jnp.log(aw)).at[:, 3].add(jnp.log(ah))

    # reorder box rows coordinate-major: [dx(a=0..3), dy(..), dw(..), dh(..)]
    w_box_k = jnp.transpose(w_box_f, (1, 0, 2)).reshape(4 * A, CFEAT)
    b_box_k = jnp.transpose(b_box_f, (1, 0)).reshape(4 * A)

    w_head = jnp.concatenate([w_cls, w_box_k], axis=0)                  # [48, 32]
    b_head = jnp.concatenate([b_cls, b_box_k], axis=0)                  # [48]

    # pre-broadcast biases to the fused lane width (lane = b*P + p) and fold the
    # anchor CENTERS into the dx/dy bias rows (lane-dependent bias is free here)
    b_bb_full = jnp.broadcast_to(b_bb[:, None], (CFEAT, BP)).astype(jnp.float32)
    cx_l = jnp.tile(cx, (B,))                                           # [BP]
    cy_l = jnp.tile(cy, (B,))
    ctr_add = jnp.concatenate([
        jnp.zeros((A * NUM_CLASSES, BP), jnp.float32),
        jnp.broadcast_to(cx_l[None, :], (A, BP)),                       # dx rows
        jnp.broadcast_to(cy_l[None, :], (A, BP)),                       # dy rows
        jnp.zeros((2 * A, BP), jnp.float32),                            # dw/dh rows
    ], axis=0)
    b_head_full = jnp.broadcast_to(b_head[:, None], (HEAD_ROWS, BP)) + ctr_add

    # per-anchor exp clamp bound: clip + log(anchor w/h), broadcast across lanes
    clipwh = jnp.concatenate([BBOX_XFORM_CLIP + jnp.log(aw),
                              BBOX_XFORM_CLIP + jnp.log(ah)])[:, None]  # [2A, 1]
    clipwh = jnp.broadcast_to(clipwh, (2 * A, BP)).astype(jnp.float32)

    return {
        "w_bb": w_bb.astype(jnp.bfloat16),
        "b_bb_full": b_bb_full,
        "w_head": w_head.astype(jnp.bfloat16),
        "b_head_full": b_head_full,
        "clipwh": clipwh,
    }


# ----------------------------- post-processing ------------------------------ #
def _pairwise_iou(boxes):
    x1, y1, x2, y2 = boxes[:, 0], boxes[:, 1], boxes[:, 2], boxes[:, 3]
    area = jnp.maximum(x2 - x1, 0.0) * jnp.maximum(y2 - y1, 0.0)
    ix1 = jnp.maximum(x1[:, None], x1[None, :])
    iy1 = jnp.maximum(y1[:, None], y1[None, :])
    ix2 = jnp.minimum(x2[:, None], x2[None, :])
    iy2 = jnp.minimum(y2[:, None], y2[None, :])
    inter = jnp.maximum(ix2 - ix1, 0.0) * jnp.maximum(iy2 - iy1, 0.0)
    union = area[:, None] + area[None, :] - inter
    return inter / jnp.maximum(union, 1e-8)


def _postprocess_image(scores_cn, boxes_kn):
    """scores_cn: [C, N] softmax probs; boxes_kn: [4, N] xyxy.  Fixed-size masked
    version of per-class threshold/top-k + batched_nms + final top-k (vectorized)."""
    # TODO(synk): PyTorch keeps variable-length per-class candidate lists; TPU needs
    #             static shapes, so invalid slots are masked with -inf instead.
    C = scores_cn.shape[0]
    boxes_n4 = boxes_kn.T                                        # [N, 4]
    scores_nc = scores_cn.T                                      # [N, C]

    fg = scores_cn[1:]                                           # [C-1, N]
    masked = jnp.where(fg > SCORE_THRESH, fg, -jnp.inf)
    top_sc, idx = jax.lax.top_k(masked, PER_CLASS_TOPK)          # [C-1, K]

    cb = boxes_n4[idx].reshape(-1, 4)
    ca = scores_nc[idx].reshape(-1, C)
    cs = top_sc.reshape(-1)
    cl = jnp.repeat(jnp.arange(1, C, dtype=jnp.int32), PER_CLASS_TOPK)
    cv = jnp.isfinite(cs)

    K = cs.shape[0]
    order = jnp.argsort(-jnp.where(cv, cs, -jnp.inf))
    b, s, l, a, v = cb[order], cs[order], cl[order], ca[order], cv[order]

    # class-aware greedy NMS (batched_nms equivalent, fixed size)
    iou = _pairwise_iou(b)
    same = l[:, None] == l[None, :]
    later = jnp.arange(K)[None, :] > jnp.arange(K)[:, None]
    sup = (iou > NMS_THRESH) & same & later

    def body(i, keep):
        return keep & ~(sup[i] & keep[i])

    keep = jax.lax.fori_loop(0, K, body, v)

    kscore = jnp.where(keep, s, -jnp.inf)
    _, kidx = jax.lax.top_k(kscore, DETECTIONS_PER_IMG)
    sel_boxes = b[kidx]
    sel_all = a[kidx]
    top_scores, tidx = jax.lax.top_k(sel_all[:, 1:], TOPK_CANDIDATES)
    labels = (tidx + 1).astype(jnp.int32)   # torch uses int64; int32 under JAX x32
    return sel_boxes, top_scores, labels


# --------------------------------- forward ---------------------------------- #
@jax.jit
def ssd_class_scores_extractor(images, params):
    """images: [B, 3, H, W] float32 (NCHW)."""
    # transform: normalize (no resize -> transform.postprocess is identity)
    mean = jnp.array([0.485, 0.456, 0.406], jnp.float32).reshape(1, 3, 1, 1)
    std = jnp.array([0.229, 0.224, 0.225], jnp.float32).reshape(1, 3, 1, 1)
    x = (images - mean) / std

    # im2col for the 4x4/stride-4 backbone conv; patch order (kh, kw, cin);
    # fused batch on lanes: lane = b*P + p.  Cast to bf16 OUTSIDE the kernel.
    x = jnp.transpose(x, (0, 2, 3, 1))                       # NHWC [B,32,32,3]
    x = x.reshape(B, FH, 4, FW, 4, CIN)
    x = jnp.transpose(x, (0, 1, 3, 2, 4, 5)).reshape(B, P, KIN)
    x_fused = jnp.transpose(x, (2, 0, 1)).reshape(KIN, BP).astype(jnp.bfloat16)

    out = pallas_ssd_fused(x_fused, params["w_bb"], params["b_bb_full"],
                           params["w_head"], params["b_head_full"],
                           params["clipwh"], (H, W))         # [48, B*P]

    # unpack the merged slab into the layouts post-processing consumes
    probs = out[:A * NUM_CLASSES].reshape(A, NUM_CLASSES, B, P)
    scores_t = jnp.transpose(probs, (2, 1, 0, 3)).reshape(B, NUM_CLASSES, N_ANCHORS)
    bx = out[A * NUM_CLASSES:].reshape(4, A, B, P)           # coord-major rows
    boxes_t = jnp.transpose(bx, (2, 0, 1, 3)).reshape(B, 4, N_ANCHORS)

    # vectorized per-image post-processing (fixed-size, vmapped over batch)
    return jax.vmap(_postprocess_image)(scores_t, boxes_t)


# ----------------------------------- main ------------------------------------ #
if __name__ == "__main__":
    key = jax.random.PRNGKey(0)
    k_img, k_par = jax.random.split(key)
    images = jax.random.uniform(k_img, (B, CIN, H, W), jnp.float32)
    params = init_params(k_par)

    boxes_b, scores_b, labels_b = ssd_class_scores_extractor(images, params)
    jax.block_until_ready((boxes_b, scores_b, labels_b))

    detections = [{"boxes": boxes_b[i], "scores": scores_b[i], "labels": labels_b[i]}
                  for i in range(B)]
    for d in detections:
        assert d["boxes"].shape == (DETECTIONS_PER_IMG, 4)
        assert d["scores"].shape == (DETECTIONS_PER_IMG, TOPK_CANDIDATES)
        assert d["labels"].shape == (DETECTIONS_PER_IMG, TOPK_CANDIDATES)
    print("KERNEL_OK")
</pallas_src>

<mosaic_0001>
module attributes {stable_mosaic.version = 11 : i64} {
  func.func @_ssd_fused_kernel(%arg0: i32, %arg1: memref<48x128xbf16, #tpu.memory_space<vmem>>, %arg2: memref<32x48xbf16, #tpu.memory_space<vmem>>, %arg3: memref<32x128xf32, #tpu.memory_space<vmem>>, %arg4: memref<48x32xbf16, #tpu.memory_space<vmem>>, %arg5: memref<48x128xf32, #tpu.memory_space<vmem>>, %arg6: memref<8x128xf32, #tpu.memory_space<vmem>>, %arg7: memref<48x128xf32, #tpu.memory_space<vmem>>) attributes {dimension_semantics = [#tpu.dimension_semantics<arbitrary>], iteration_bounds = array<i64: 1>, scalar_prefetch = 0 : i64, scratch_operands = 0 : i64, tpu.core_type = #tpu.core_type<tc>, window_params = [{pipeline_mode = #tpu.pipeline_mode<synchronous>, transform_indices = @transform_0, window_bounds = array<i64: 48, 128>}, {pipeline_mode = #tpu.pipeline_mode<synchronous>, transform_indices = @transform_1, window_bounds = array<i64: 32, 48>}, {pipeline_mode = #tpu.pipeline_mode<synchronous>, transform_indices = @transform_2, window_bounds = array<i64: 32, 128>}, {pipeline_mode = #tpu.pipeline_mode<synchronous>, transform_indices = @transform_3, window_bounds = array<i64: 48, 32>}, {pipeline_mode = #tpu.pipeline_mode<synchronous>, transform_indices = @transform_4, window_bounds = array<i64: 48, 128>}, {pipeline_mode = #tpu.pipeline_mode<synchronous>, transform_indices = @transform_5, window_bounds = array<i64: 8, 128>}, {pipeline_mode = #tpu.pipeline_mode<synchronous>, transform_indices = @transform_6, window_bounds = array<i64: 48, 128>}]} {
    %c0 = arith.constant 0 : index
    %c0_0 = arith.constant 0 : index
    %0 = vector.load %arg2[%c0, %c0_0] : memref<32x48xbf16, #tpu.memory_space<vmem>>, vector<32x48xbf16>
    %c0_1 = arith.constant 0 : index
    %c0_2 = arith.constant 0 : index
    %1 = vector.load %arg1[%c0_1, %c0_2] : memref<48x128xbf16, #tpu.memory_space<vmem>>, vector<48x128xbf16>
    %cst = arith.constant dense<0.000000e+00> : vector<32x128xf32>
    %2 = tpu.matmul %0, %1, %cst {dimension_numbers = #tpu.dot_dimension_numbers<[1], [0], [0], [1], [0, 0, 1, 1], [], []>} : vector<32x48xbf16>, vector<48x128xbf16>, vector<32x128xf32> -> vector<32x128xf32>
    %c0_3 = arith.constant 0 : index
    %c0_4 = arith.constant 0 : index
    %3 = vector.load %arg3[%c0_3, %c0_4] : memref<32x128xf32, #tpu.memory_space<vmem>>, vector<32x128xf32>
    %4 = arith.addf %2, %3 : vector<32x128xf32>
    %cst_5 = arith.constant 0.000000e+00 : f32
    %5 = vector.broadcast %cst_5 : f32 to vector<32x128xf32>
    %6 = arith.maximumf %4, %5 : vector<32x128xf32>
    %c0_6 = arith.constant 0 : index
    %c0_7 = arith.constant 0 : index
    %7 = vector.load %arg4[%c0_6, %c0_7] : memref<48x32xbf16, #tpu.memory_space<vmem>>, vector<48x32xbf16>
    %8 = arith.truncf %6 : vector<32x128xf32> to vector<32x128xbf16>
    %cst_8 = arith.constant dense<0.000000e+00> : vector<48x128xf32>
    %9 = tpu.matmul %7, %8, %cst_8 {dimension_numbers = #tpu.dot_dimension_numbers<[1], [0], [0], [1], [0, 0, 1, 1], [], []>} : vector<48x32xbf16>, vector<32x128xbf16>, vector<48x128xf32> -> vector<48x128xf32>
    %c0_9 = arith.constant 0 : index
    %c0_10 = arith.constant 0 : index
    %10 = vector.load %arg5[%c0_9, %c0_10] : memref<48x128xf32, #tpu.memory_space<vmem>>, vector<48x128xf32>
    %11 = arith.addf %9, %10 : vector<48x128xf32>
    %12 = vector.extract_strided_slice %11 {offsets = [0, 0], sizes = [32, 128], strides = [1, 1]} : vector<48x128xf32> to vector<32x128xf32>
    %13 = vector.shape_cast %12 : vector<32x128xf32> to vector<4x8x128xf32>
    %cst_11 = arith.constant dense<0xFF800000> : vector<4x128xf32>
    %14 = vector.multi_reduction <maximumf>, %13, %cst_11 [1] : vector<4x8x128xf32> to vector<4x128xf32>
    %15 = vector.shape_cast %14 : vector<4x128xf32> to vector<4x1x128xf32>
    %16 = vector.broadcast %15 : vector<4x1x128xf32> to vector<4x8x128xf32>
    %17 = arith.subf %13, %16 : vector<4x8x128xf32>
    %18 = math.exp %17 : vector<4x8x128xf32>
    %cst_12 = arith.constant dense<0.000000e+00> : vector<4x128xf32>
    %19 = vector.multi_reduction <add>, %18, %cst_12 [1] : vector<4x8x128xf32> to vector<4x128xf32>
    %20 = vector.shape_cast %19 : vector<4x128xf32> to vector<4x1x128xf32>
    %21 = vector.broadcast %20 : vector<4x1x128xf32> to vector<4x8x128xf32>
    %22 = arith.divf %18, %21 : vector<4x8x128xf32>
    %23 = vector.shape_cast %22 : vector<4x8x128xf32> to vector<32x128xf32>
    %24 = vector.extract_strided_slice %11 {offsets = [32, 0], sizes = [8, 128], strides = [1, 1]} : vector<48x128xf32> to vector<8x128xf32>
    %25 = vector.extract_strided_slice %11 {offsets = [40, 0], sizes = [8, 128], strides = [1, 1]} : vector<48x128xf32> to vector<8x128xf32>
    %c0_13 = arith.constant 0 : index
    %c0_14 = arith.constant 0 : index
    %26 = vector.load %arg6[%c0_13, %c0_14] : memref<8x128xf32, #tpu.memory_space<vmem>>, vector<8x128xf32>
    %27 = arith.minimumf %25, %26 : vector<8x128xf32>
    %28 = math.exp %27 : vector<8x128xf32>
    %cst_15 = arith.constant 5.000000e-01 : f32
    %29 = vector.broadcast %cst_15 : f32 to vector<8x128xf32>
    %30 = arith.mulf %29, %28 : vector<8x128xf32>
    %cst_16 = arith.constant 3.200000e+01 : f32
    %31 = vector.broadcast %cst_16 : f32 to vector<4x128xf32>
    %cst_17 = arith.constant 3.200000e+01 : f32
    %32 = vector.broadcast %cst_17 : f32 to vector<4x128xf32>
    %33 = tpu.concatenate %31, %32 in 0 : vector<4x128xf32>, vector<4x128xf32> -> vector<8x128xf32>
    %34 = arith.subf %24, %30 : vector<8x128xf32>
    %cst_18 = arith.constant 0.000000e+00 : f32
    %35 = vector.broadcast %cst_18 : f32 to vector<8x128xf32>
    %36 = arith.maximumf %34, %35 : vector<8x128xf32>
    %37 = arith.minimumf %36, %33 : vector<8x128xf32>
    %38 = arith.addf %24, %30 : vector<8x128xf32>
    %cst_19 = arith.constant 0.000000e+00 : f32
    %39 = vector.broadcast %cst_19 : f32 to vector<8x128xf32>
    %40 = arith.maximumf %38, %39 : vector<8x128xf32>
    %41 = arith.minimumf %40, %33 : vector<8x128xf32>
    %42 = tpu.concatenate %23, %37, %41 in 0 : vector<32x128xf32>, vector<8x128xf32>, vector<8x128xf32> -> vector<48x128xf32>
    %c0_20 = arith.constant 0 : index
    %c0_21 = arith.constant 0 : index
    %43 = vector.load %arg7[%c0_20, %c0_21] : memref<48x128xf32, #tpu.memory_space<vmem>>, vector<48x128xf32>
    tpu.vector_store %arg7[%c0_20, %c0_21], %42 {strides = array<i32>} : memref<48x128xf32, #tpu.memory_space<vmem>>, vector<48x128xf32>,
    return
  }
  func.func @transform_0(%arg0: i32) -> (i32, i32) {
    %c0_i32 = arith.constant 0 : i32
    %c0_i32_0 = arith.constant 0 : i32
    %c0_i32_1 = arith.constant 0 : i32
    return %c0_i32, %c0_i32_0 : i32, i32
  }
  func.func @transform_1(%arg0: i32) -> (i32, i32) {
    %c0_i32 = arith.constant 0 : i32
    %c0_i32_0 = arith.constant 0 : i32
    %c0_i32_1 = arith.constant 0 : i32
    return %c0_i32, %c0_i32_0 : i32, i32
  }
  func.func @transform_2(%arg0: i32) -> (i32, i32) {
    %c0_i32 = arith.constant 0 : i32
    %c0_i32_0 = arith.constant 0 : i32
    %c0_i32_1 = arith.constant 0 : i32
    return %c0_i32, %c0_i32_0 : i32, i32
  }
  func.func @transform_3(%arg0: i32) -> (i32, i32) {
    %c0_i32 = arith.constant 0 : i32
    %c0_i32_0 = arith.constant 0 : i32
    %c0_i32_1 = arith.constant 0 : i32
    return %c0_i32, %c0_i32_0 : i32, i32
  }
  func.func @transform_4(%arg0: i32) -> (i32, i32) {
    %c0_i32 = arith.constant 0 : i32
    %c0_i32_0 = arith.constant 0 : i32
    %c0_i32_1 = arith.constant 0 : i32
    return %c0_i32, %c0_i32_0 : i32, i32
  }
  func.func @transform_5(%arg0: i32) -> (i32, i32) {
    %c0_i32 = arith.constant 0 : i32
    %c0_i32_0 = arith.constant 0 : i32
    %c0_i32_1 = arith.constant 0 : i32
    return %c0_i32, %c0_i32_0 : i32, i32
  }
  func.func @transform_6(%arg0: i32) -> (i32, i32) {
    %c0_i32 = arith.constant 0 : i32
    %c0_i32_0 = arith.constant 0 : i32
    %c0_i32_1 = arith.constant 0 : i32
    return %c0_i32, %c0_i32_0 : i32, i32
  }
}

</mosaic_0001>

<bundles_post_ra>
// kernel: ssd_class_scores_extractor.1
= control target key start
LH: loop header
LB: loop body
LE: loop exit
PB: predicated region body
PF: predicated region fallthrough
CT: control target
= control target key end

     0   :  { %vm66_vm0 = vcmask 392192   ;;  %v388_v5 = vmov 0.0   ;;  %vm389_vm1 = vmmov 0   ;;  %vm155_vm2 = vcmask 261120   ;;  %s503_s0 = inlined_call_operand.vmem [shape: bf16[48,128], index: 0, kind: input, shape index: {}]   ;;  %s504_s1 = inlined_call_operand.vmem [shape: bf16[32,48], index: 1, kind: input, shape index: {}]   ;;  %s505_s3 = inlined_call_operand.vmem [shape: bf16[48,32], index: 3, kind: input, shape index: {}]   ;;  %s506_s2 = inlined_call_operand.vmem [shape: f32[32,128], index: 2, kind: input, shape index: {}]   ;;  %s507_s4 = inlined_call_operand.vmem [shape: f32[48,128], index: 4, kind: input, shape index: {}]   ;;  %s508_s5 = inlined_call_operand.vmem [shape: f32[8,128], index: 5, kind: input, shape index: {}]   ;;  %s509_s6 = inlined_call_operand.vmem [shape: f32[48,128], index: 6, kind: output, shape index: {}]  }
   0x1   :  { %v362_v0 = vld [vmem:[%s503_s0 + $0x10] sm:$0xff]   ;;  %v363_v1 = vld [vmem:[%s503_s0 + $0x8] sm:$0xff]   ;;  %v365_v2 = vld [vmem:[%s504_s1] sm:$0xff]   ;;  %344 = vmatprep.subr.bf16.mxu1 %v388_v5  ;;  %348 = vmatprep.mubr.msk.bf16.mxu1 %vm389_vm1, %v388_v5 }
   0x2   :  { %334 = vmatprep.subr.bf16.mxu0 %v362_v0  ;;  %v364_v3 = vld [vmem:[%s503_s0] sm:$0xff]   ;;  %340 = vmatprep.mubr.msk.bf16.mxu0 %vm66_vm0, %v365_v2  ;;  %v366_v4 = vld [vmem:[%s504_s1 + $0x8] sm:$0xff]   ;;  %v36_v6 = vld [vmem:[%s506_s2 + $0x10] sm:$0xff] }
   0x3   :  { %335 = vmatpush3.bf16.msra.mxu0 %v362_v0  ;;  %v37_v9 = vld [vmem:[%s506_s2 + $0x18] sm:$0xff]  ;;  %v34_v11 = vld [vmem:[%s506_s2] sm:$0xff]  ;;  %v35_v13 = vld [vmem:[%s506_s2 + $0x8] sm:$0xff] }
   0x4   :  { %336 = vmatprep.subr.bf16.mxu0 %v363_v1  ;;  %v367_v24 = vld [vmem:[%s505_s3] sm:$0xff]   ;;  %v368_v25 = vld [vmem:[%s505_s3 + $0x8] sm:$0xff]   ;;  %v369_v26 = vld [vmem:[%s505_s3 + $0x10] sm:$0xff]  }
   0x5   :  { %v134_v27 = vld [vmem:[%s507_s4] sm:$0xff]  ;;  %v135_v31 = vld [vmem:[%s507_s4 + $0x8] sm:$0xff]  ;;  %v136_v37 = vld [vmem:[%s507_s4 + $0x10] sm:$0xff] }
   0x6   :  { %v137_v45 = vld [vmem:[%s507_s4 + $0x18] sm:$0xff] }
   0x7   :  { %337 = vmatpush3.bf16.msra.mxu0 %v363_v1  ;;  %v139_v1 = vld [vmem:[%s507_s4 + $0x28] sm:$0xff] }
   0x8   :  { %338 = vmatprep.subr.bf16.mxu0 %v364_v3 }
   0xb   :  { %339 = vmatpush3.bf16.msra.mxu0 %v364_v3 }
   0xe   :  { %341 = vmatmul.mubr.msk.bf16.vlgmr.msra.gmra.mxu0 %vm66_vm0, %v366_v4 }
  0xce   :  { %v342_v7 = vpop.f32.mrf.mxu0 }
  0xcf   :  { %v116_v10 = vadd.f32 %v342_v7, %v36_v6  ;;  %v290_v6 = vld [vmem:[%s508_s5] sm:$0xff] }
  0xd0   :  { %v107_v8 = vpop.f32.mrf.mxu0 }
  0xd1   :  { %v124_v16 = vmax.f32 %v116_v10, 0.0  ;;  %v108_v17 = vadd.f32 %v107_v8, %v34_v11 }
  0xd2   :  { %v343_v12 = vpop.f32.mrf.mxu0 }
  0xd3   :  { %v119_v14 = vadd.f32 %v343_v12, %v37_v9  ;;  %v122_v22 = vmax.f32 %v108_v17, 0.0 }
  0xd4   :  { %v110_v15 = vpop.f32.mrf.mxu0 }
  0xd5   :  { %v125_v18 = vmax.f32 %v119_v14, 0.0  ;;  %v111_v19 = vadd.f32 %v110_v15, %v35_v13 }
  0xd7   :  { %v123_v20 = vmax.f32 %v111_v19, 0.0  ;;  %v133_v21 = vpack.c.bf16 %v125_v18, %v124_v16 }
  0xd9   :  { %345 = vmatpush3.bf16.msra.mxu1 %v133_v21  ;;  %v132_v23 = vpack.c.bf16 %v123_v20, %v122_v22 }
  0xda   :  { %346 = vmatprep.subr.bf16.mxu1 %v388_v5 }
  0xdd   :  { %347 = vmatpush3.bf16.msra.mxu1 %v132_v23 }
  0xe0   :  { %349 = vmatmul.mubr.msk.bf16.vlgmr.msra.gmra.mxu1 %vm155_vm2, %v367_v24 }
  0xe1   :  { %352 = vmatprep.mubr.msk.bf16.mxu1 %vm389_vm1, %v388_v5 }
  0xe8   :  { %353 = vmatmul.mubr.msk.bf16.gmra.mxu1 %vm155_vm2, %v368_v25 }
  0xe9   :  { %356 = vmatprep.mubr.msk.bf16.mxu1 %vm389_vm1, %v388_v5 }
  0xf0   :  { %357 = vmatmul.mubr.msk.bf16.gmra.mxu1 %vm155_vm2, %v369_v26  ;;  %v138_v26 = vld [vmem:[%s507_s4 + $0x20] sm:$0xff] }
 0x1a0   :  { %v199_v28 = vpop.f32.mrf.mxu1 }
 0x1a1   :  { %v200_v29 = vadd.f32 %v199_v28, %v134_v27 }
 0x1a2   :  { %v350_v30 = vpop.f32.mrf.mxu1 }
 0x1a3   :  { %v222_v32 = vrot.slane %v200_v29, 4 }
 0x1a4   :  { %v202_v33 = vpop.f32.mrf.mxu1 }
 0x1a5   :  { %v223_v34 = vmax.f32 %v200_v29, %v222_v32  ;;  %v203_v35 = vadd.f32 %v202_v33, %v135_v31 }
 0x1a6   :  { %v351_v36 = vpop.f32.mrf.mxu1 }
 0x1a7   :  { %v224_v38 = vrot.slane %v223_v34, 2  ;;  %v228_v39 = vrot.slane %v203_v35, 4 }
 0x1a8   :  { %v207_v40 = vpop.f32.mrf.mxu1 }
 0x1a9   :  { %v225_v41 = vmax.f32 %v223_v34, %v224_v38  ;;  %v229_v42 = vmax.f32 %v203_v35, %v228_v39  ;;  %v208_v43 = vadd.f32 %v207_v40, %v136_v37 }
 0x1aa   :  { %v354_v44 = vpop.f32.mrf.mxu1 }
 0x1ab   :  { %v226_v46 = vrot.slane %v225_v41, 1  ;;  %v230_v47 = vrot.slane %v229_v42, 2  ;;  %v234_v48 = vrot.slane %v208_v43, 4 }
 0x1ac   :  { %v210_v49 = vpop.f32.mrf.mxu1 }
 0x1ad   :  { %v227_v50 = vmax.f32 %v225_v41, %v226_v46  ;;  %v231_v51 = vmax.f32 %v229_v42, %v230_v47  ;;  %v235_v52 = vmax.f32 %v208_v43, %v234_v48  ;;  %v211_v53 = vadd.f32 %v210_v49, %v137_v45 }
 0x1ae   :  { %v355_v54 = vpop.f32.mrf.mxu1 }
 0x1af   :  { %v246_v55 = vsub.f32 %v200_v29, %v227_v50  ;;  %v232_v56 = vrot.slane %v231_v51, 1  ;;  %v236_v57 = vrot.slane %v235_v52, 2  ;;  %v240_v58 = vrot.slane %v211_v53, 4 }
 0x1b0   :  { %v215_v59 = vpop.f32.mrf.mxu1 }
 0x1b1   :  { %v250_v60 = vmul.f32 1.442695, %v246_v55  ;;  %v233_v61 = vmax.f32 %v231_v51, %v232_v56  ;;  %v237_v62 = vmax.f32 %v235_v52, %v236_v57  ;;  %v241_v63 = vmax.f32 %v211_v53, %v240_v58 }
 0x1b2   :  { %v358_v0 = vpop.f32.mrf.mxu1  ;;  %v216_v30 = vadd.f32 %v215_v59, %v138_v26 }
 0x1b3   :  { %370 = vpow2.f32 %v250_v60  ;;  %v247_v2 = vsub.f32 %v203_v35, %v233_v61  ;;  %v238_v3 = vrot.slane %v237_v62, 1  ;;  %v242_v4 = vrot.slane %v241_v63, 2 }
 0x1b4   :  { %v218_v5 = vpop.f32.mrf.mxu1 }
 0x1b5   :  { %v252_v7 = vmul.f32 1.442695, %v247_v2  ;;  %v239_v8 = vmax.f32 %v237_v62, %v238_v3  ;;  %v243_v9 = vmax.f32 %v241_v63, %v242_v4  ;;  %v219_v10 = vadd.f32 %v218_v5, %v139_v1 }
 0x1b6   :  { %v359_v11 = vpop.f32.mrf.mxu1 }
 0x1b7   :  { %372 = vpow2.f32 %v252_v7  ;;  %v248_v12 = vsub.f32 %v208_v43, %v239_v8  ;;  %v244_v13 = vrot.slane %v243_v9, 1  ;;  %v291_v14 = vmin.f32 %v219_v10, %v290_v6 }
 0x1b9   :  { %v254_v15 = vmul.f32 1.442695, %v248_v12  ;;  %v245_v16 = vmax.f32 %v243_v9, %v244_v13  ;;  %v292_v17 = vmul.f32 1.442695, %v291_v14 }
 0x1bb   :  { %374 = vpow2.f32 %v254_v15  ;;  %v249_v18 = vsub.f32 %v211_v53, %v245_v16 }
 0x1bc   :  { %376 = vpow2.f32 %v292_v17 }
 0x1bd   :  { %v256_v19 = vmul.f32 1.442695, %v249_v18 }
 0x1bf   :  { %378 = vpow2.f32 %v256_v19 }
 0x1c0   :  { %v371_v20 = vpop.eup %370 }
 0x1c1   :  { %v258_v21 = vrot.slane %v371_v20, 4 }
 0x1c3   :  { %v259_v22 = vadd.f32 %v371_v20, %v258_v21 }
 0x1c4   :  { %v373_v23 = vpop.eup %372 }
 0x1c5   :  { %v260_v24 = vrot.slane %v259_v22, 2  ;;  %v264_v25 = vrot.slane %v373_v23, 4 }
 0x1c7   :  { %v261_v27 = vadd.f32 %v260_v24, %v259_v22  ;;  %v265_v28 = vadd.f32 %v373_v23, %v264_v25 }
 0x1c8   :  { %v375_v29 = vpop.eup %374 }
 0x1c9   :  { %v377_v31 = vpop.eup %376  ;;  %v262_v32 = vrot.slane %v261_v27, 1  ;;  %v266_v33 = vrot.slane %v265_v28, 2  ;;  %v270_v34 = vrot.slane %v375_v29, 4 }
 0x1ca   :  { %v294_v35 = vmul.f32 0.5, %v377_v31 }
 0x1cb   :  { %v263_v36 = vadd.f32 %v262_v32, %v261_v27  ;;  %v267_v37 = vadd.f32 %v266_v33, %v265_v28  ;;  %v271_v38 = vadd.f32 %v375_v29, %v270_v34 }
 0x1cc   :  { %v379_v39 = vpop.eup %378  ;;  %v295_v40 = vsub.f32 %v216_v30, %v294_v35  ;;  %v298_v41 = vadd.f32 %v294_v35, %v216_v30 }
 0x1cd   :  { %380 = vrcp.f32 %v263_v36  ;;  %v268_v42 = vrot.slane %v267_v37, 1  ;;  %v272_v43 = vrot.slane %v271_v38, 2  ;;  %v276_v44 = vrot.slane %v379_v39, 4 }
 0x1ce   :  { %v296_v45 = vmax.f32 %v295_v40, 0.0  ;;  %v299_v46 = vmax.f32 %v298_v41, 0.0 }
 0x1cf   :  { %v269_v47 = vadd.f32 %v268_v42, %v267_v37  ;;  %v273_v48 = vadd.f32 %v272_v43, %v271_v38  ;;  %v277_v49 = vadd.f32 %v379_v39, %v276_v44 }
 0x1d0   :  { %v297_v50 = vmin.f32 %v296_v45, 32.0  ;;  %v300_v51 = vmin.f32 %v299_v46, 32.0 }
 0x1d1   :  { %382 = vrcp.f32 %v269_v47  ;;  %v274_v52 = vrot.slane %v273_v48, 1  ;;  %v278_v53 = vrot.slane %v277_v49, 2 }
 0x1d2   :  { %305 = vst [vmem:[%s509_s6 + $0x20] sm:$0xff] %v297_v50  ;;  %306 = vst [vmem:[%s509_s6 + $0x28] sm:$0xff] %v300_v51 }
 0x1d3   :  { %v275_v54 = vadd.f32 %v274_v52, %v273_v48  ;;  %v279_v55 = vadd.f32 %v278_v53, %v277_v49 }
 0x1d5   :  { %384 = vrcp.f32 %v275_v54  ;;  %v280_v56 = vrot.slane %v279_v55, 1 }
 0x1d7   :  { %v281_v57 = vadd.f32 %v280_v56, %v279_v55 }
 0x1d9   :  { %386 = vrcp.f32 %v281_v57 }
 0x1da   :  { %v381_v58 = vpop.eup %380 }
 0x1db   :  { %v283_v59 = vmul.f32 %v381_v58, %v371_v20 }
 0x1dd   :  { %301 = vst [vmem:[%s509_s6] sm:$0xff] %v283_v59 }
 0x1de   :  { %v383_v60 = vpop.eup %382 }
 0x1df   :  { %v285_v61 = vmul.f32 %v383_v60, %v373_v23 }
 0x1e1   :  { %302 = vst [vmem:[%s509_s6 + $0x8] sm:$0xff] %v285_v61 }
 0x1e2   :  { %v385_v62 = vpop.eup %384 }
 0x1e3   :  { %v287_v63 = vmul.f32 %v385_v62, %v375_v29 }
 0x1e5   :  { %303 = vst [vmem:[%s509_s6 + $0x10] sm:$0xff] %v287_v63 }
 0x1e6   :  { %v387_v0 = vpop.eup %386 }
 0x1e7   :  { %v289_v1 = vmul.f32 %v387_v0, %v379_v39 }
 0x1e9   :  { %304 = vst [vmem:[%s509_s6 + $0x18] sm:$0xff] %v289_v1 }

</bundles_post_ra>
